<compile_context>
chip_gen: v5e
topology: v5e:2x2
jax: 0.10.0
libtpu: 0.0.40
codegen_flags: <defaults>
</compile_context>

<pallas_src>
import functools
import math

import jax
import jax.numpy as jnp
from jax import lax
from jax.experimental import pallas as pl
from jax.experimental.pallas import tpu as pltpu

BN_EPS = 1e-5


def _round_up(x, m):
    return ((x + m - 1) // m) * m


def conv_stats_kernel(w_ref, p_ref, y_ref, stats_ref):
    """Phase 1: conv as a single matmul + per-tile partial BN statistics.

    w_ref:     (Cout, K)      bf16 flattened conv weights, K = KH*KW*Cin
    p_ref:     (K, TM)        bf16 im2col patch tile (batch*spatial on lanes)
    y_ref:     (Cout, TM)     bf16 pre-BN conv output tile
    stats_ref: (1, Cout, 2)   f32 per-tile [sum, sum-of-squares] per channel
    """
    # One MXU push per tile; bf16 operands feed the MXU natively, f32 accumulate.
    y = jnp.dot(w_ref[...], p_ref[...], preferred_element_type=jnp.float32)
    y_ref[...] = y.astype(y_ref.dtype)

    # One-pass statistics from the f32 accumulator (before the bf16 downcast);
    # lane reductions go to the XLU (free slot next to the MXU push).
    s = jnp.sum(y, axis=1, keepdims=True)          # (Cout, 1)
    ss = jnp.sum(y * y, axis=1, keepdims=True)     # (Cout, 1)
    stats_ref[...] = jnp.concatenate([s, ss], axis=1)[None, :, :]


def bn_relu_kernel(ss_ref, y_ref, o_ref):
    """Phase 2: per-channel affine + ReLU per tile (finalize already hoisted).

    ss_ref: (Cout, 2)    column 0 = scale, column 1 = shift (f32)
    y_ref:  (Cout, TM)   bf16 conv output tile
    o_ref:  (Cout, TM)   f32 final output tile
    """
    scale = ss_ref[:, 0:1]
    shift = ss_ref[:, 1:2]
    y = y_ref[...].astype(jnp.float32)
    o_ref[...] = jnp.maximum(y * scale + shift, 0.0).astype(o_ref.dtype)


def convbr_forward(x_nchw, w_oihw, gamma, beta, *, stride=1, padding=1,
                   tile_m=2048):
    """Pallas ConvBR forward. Takes/returns NCHW to mirror the PyTorch module."""
    assert stride == 1, "kernel implements stride=1"
    N, Cin, H, W = x_nchw.shape
    Cout, _, KH, KW = w_oihw.shape
    Ho = H + 2 * padding - KH + 1
    Wo = W + 2 * padding - KW + 1
    M = N * Ho * Wo
    K = KH * KW * Cin

    # Big-but-bounded tiles: don't pad tiny problems all the way to tile_m.
    tile_m = min(tile_m, _round_up(M, 512))
    assert tile_m % 128 == 0
    M_pad = _round_up(M, tile_m)
    num_tiles = M_pad // tile_m

    # ---- wrapper glue (layout only) -------------------------------------
    # Build the im2col patches directly in (K, M) order: channel-first padded
    # input, 9 shifted taps stacked on a new leading axis.  No (M,K)->(K,M)
    # relayout pass over the 9x-inflated array.
    x_cnhw = jnp.transpose(x_nchw, (1, 0, 2, 3))                 # (Cin, N, H, W)
    x_pad = jnp.pad(x_cnhw, ((0, 0), (0, 0),
                             (padding, padding), (padding, padding)))
    taps = [x_pad[:, :, kh:kh + Ho, kw:kw + Wo]
            for kh in range(KH) for kw in range(KW)]             # each (Cin,N,Ho,Wo)
    patches_km = jnp.stack(taps, axis=0).reshape(K, M)           # K = (kh,kw,cin)
    patches_km = patches_km.astype(jnp.bfloat16)
    if M_pad > M:
        # Zero columns: contribute 0 to sum and sumsq -> stats stay exact.
        patches_km = jnp.pad(patches_km, ((0, 0), (0, M_pad - M)))

    # (Cout, K) with the same (kh, kw, cin) ordering as the patches.
    w_flat = jnp.transpose(w_oihw, (0, 2, 3, 1)).reshape(Cout, K)
    w_flat = w_flat.astype(jnp.bfloat16)

    cparams = pltpu.CompilerParams(
        dimension_semantics=("parallel",),
        vmem_limit_bytes=32 * 1024 * 1024,   # explicit; well under v7x's 64 MiB
    )

    # ---- Phase 1: conv (one matmul per tile) + per-tile partial BN stats --
    conv_out, part_stats = pl.pallas_call(
        conv_stats_kernel,
        out_shape=(jax.ShapeDtypeStruct((Cout, M_pad), jnp.bfloat16),
                   jax.ShapeDtypeStruct((num_tiles, Cout, 2), jnp.float32)),
        grid=(num_tiles,),
        in_specs=[pl.BlockSpec((Cout, K), lambda i: (0, 0)),
                  # If xprof shows exposed DMA on v5e, add
                  # pipeline_mode=pl.Buffered(3) to this spec.
                  pl.BlockSpec((K, tile_m), lambda i: (0, i))],
        out_specs=(pl.BlockSpec((Cout, tile_m), lambda i: (0, i)),
                   pl.BlockSpec((1, Cout, 2), lambda i: (i, 0, 0))),
        compiler_params=cparams,
    )(w_flat, patches_km)

    # ---- BN finalize, hoisted out of the per-tile loop (tiny) -------------
    tot = jnp.sum(part_stats, axis=0)                      # (Cout, 2)
    inv_m = 1.0 / M                                        # real M, not M_pad
    mean = tot[:, 0] * inv_m
    var = tot[:, 1] * inv_m - mean * mean                  # biased (training-mode)
    scale = gamma.astype(jnp.float32) * lax.rsqrt(var + BN_EPS)
    shift = beta.astype(jnp.float32) - mean * scale
    scale_shift = jnp.stack([scale, shift], axis=-1)       # (Cout, 2)

    # ---- Phase 2: pure per-channel FMA + ReLU stream ----------------------
    out_flat = pl.pallas_call(
        bn_relu_kernel,
        out_shape=jax.ShapeDtypeStruct((Cout, M_pad), jnp.float32),
        grid=(num_tiles,),
        in_specs=[pl.BlockSpec((Cout, 2), lambda i: (0, 0)),
                  pl.BlockSpec((Cout, tile_m), lambda i: (0, i))],
        out_specs=pl.BlockSpec((Cout, tile_m), lambda i: (0, i)),
        compiler_params=cparams,
    )(scale_shift, conv_out)

    # (Cout, M) -> (N, Cout, Ho, Wo): wrapper layout only.
    out = out_flat[:, :M].reshape(Cout, N, Ho, Wo)
    return jnp.transpose(out, (1, 0, 2, 3))


def reference_forward(x_nchw, w_oihw, gamma, beta, *, padding=1):
    """Pure-JAX reference (conv + training-mode BN + ReLU) for verification."""
    y = lax.conv_general_dilated(
        x_nchw, w_oihw, window_strides=(1, 1),
        padding=[(padding, padding), (padding, padding)],
        dimension_numbers=("NCHW", "OIHW", "NCHW"))
    mean = jnp.mean(y, axis=(0, 2, 3), keepdims=True)
    var = jnp.mean((y - mean) ** 2, axis=(0, 2, 3), keepdims=True)
    y = (y - mean) * lax.rsqrt(var + BN_EPS)
    y = y * gamma.reshape(1, -1, 1, 1) + beta.reshape(1, -1, 1, 1)
    return jnp.maximum(y, 0.0)


if __name__ == "__main__":
    # ConvBR(in_channel=4, out_channel=8, kernel_size=3, stride=1, padding=1)
    N, Cin, H, W = 2, 4, 16, 16
    Cout, KH, KW = 8, 3, 3
    padding = 1

    key = jax.random.PRNGKey(0)
    kx, kw, kg, kb = jax.random.split(key, 4)

    x = jax.random.normal(kx, (N, Cin, H, W), dtype=jnp.float32)

    # kaiming_normal_(weight, a=1): gain = sqrt(2/(1+a^2)) = 1, std = 1/sqrt(fan_in)
    fan_in = Cin * KH * KW
    w = jax.random.normal(kw, (Cout, Cin, KH, KW), dtype=jnp.float32) / math.sqrt(fan_in)

    # PyTorch BN default init is weight=1, bias=0; perturb slightly so the
    # affine path is actually exercised by the correctness check.
    gamma = 1.0 + 0.1 * jax.random.normal(kg, (Cout,), dtype=jnp.float32)
    beta = 0.1 * jax.random.normal(kb, (Cout,), dtype=jnp.float32)

    fwd = jax.jit(functools.partial(convbr_forward, stride=1, padding=padding))
    out = jax.block_until_ready(fwd(x, w, gamma, beta))

    ref = reference_forward(x, w, gamma, beta, padding=padding)
    assert out.shape == (N, Cout, H, W), out.shape
    # bf16 patches/weights + bf16 conv_out intermediate -> loosened tolerance
    # (stats themselves come from the f32 accumulator and stay exact).
    assert jnp.allclose(out, ref, rtol=5e-2, atol=5e-2), \
        float(jnp.max(jnp.abs(out - ref)))

    print("KERNEL_OK")
</pallas_src>

<mosaic_0001>
module attributes {stable_mosaic.version = 11 : i64} {
  func.func @conv_stats_kernel(%arg0: i32, %arg1: memref<8x36xbf16, #tpu.memory_space<vmem>>, %arg2: memref<36x512xbf16, #tpu.memory_space<vmem>>, %arg3: memref<8x512xbf16, #tpu.memory_space<vmem>>, %arg4: memref<1x8x2xf32, #tpu.memory_space<vmem>>) attributes {dimension_semantics = [#tpu.dimension_semantics<parallel>], iteration_bounds = array<i64: 1>, scalar_prefetch = 0 : i64, scratch_operands = 0 : i64, tpu.core_type = #tpu.core_type<tc>, window_params = [{pipeline_mode = #tpu.pipeline_mode<synchronous>, transform_indices = @transform_0, window_bounds = array<i64: 8, 36>}, {transform_indices = @transform_1, window_bounds = array<i64: 36, 512>}, {transform_indices = @transform_2, window_bounds = array<i64: 8, 512>}, {transform_indices = @transform_3, window_bounds = array<i64: 1, 8, 2>}]} {
    %c0 = arith.constant 0 : index
    %c0_0 = arith.constant 0 : index
    %0 = vector.load %arg1[%c0, %c0_0] : memref<8x36xbf16, #tpu.memory_space<vmem>>, vector<8x36xbf16>
    %c0_1 = arith.constant 0 : index
    %c0_2 = arith.constant 0 : index
    %1 = vector.load %arg2[%c0_1, %c0_2] : memref<36x512xbf16, #tpu.memory_space<vmem>>, vector<36x512xbf16>
    %cst = arith.constant dense<0.000000e+00> : vector<8x512xf32>
    %2 = tpu.matmul %0, %1, %cst {dimension_numbers = #tpu.dot_dimension_numbers<[1], [0], [0], [1], [0, 0, 1, 1], [], []>} : vector<8x36xbf16>, vector<36x512xbf16>, vector<8x512xf32> -> vector<8x512xf32>
    %3 = arith.truncf %2 : vector<8x512xf32> to vector<8x512xbf16>
    %c0_3 = arith.constant 0 : index
    %c0_4 = arith.constant 0 : index
    %4 = vector.load %arg3[%c0_3, %c0_4] : memref<8x512xbf16, #tpu.memory_space<vmem>>, vector<8x512xbf16>
    tpu.vector_store %arg3[%c0_3, %c0_4], %3 {strides = array<i32>} : memref<8x512xbf16, #tpu.memory_space<vmem>>, vector<8x512xbf16>,
    %cst_5 = arith.constant dense<0.000000e+00> : vector<8xf32>
    %5 = vector.multi_reduction <add>, %2, %cst_5 [1] : vector<8x512xf32> to vector<8xf32>
    %6 = vector.shape_cast %5 : vector<8xf32> to vector<8x1xf32>
    %7 = arith.mulf %2, %2 : vector<8x512xf32>
    %cst_6 = arith.constant dense<0.000000e+00> : vector<8xf32>
    %8 = vector.multi_reduction <add>, %7, %cst_6 [1] : vector<8x512xf32> to vector<8xf32>
    %9 = vector.shape_cast %8 : vector<8xf32> to vector<8x1xf32>
    %10 = tpu.concatenate %6, %9 in 1 : vector<8x1xf32>, vector<8x1xf32> -> vector<8x2xf32>
    %11 = vector.shape_cast %10 : vector<8x2xf32> to vector<1x8x2xf32>
    %c0_7 = arith.constant 0 : index
    %c0_8 = arith.constant 0 : index
    %c0_9 = arith.constant 0 : index
    %12 = vector.load %arg4[%c0_7, %c0_8, %c0_9] : memref<1x8x2xf32, #tpu.memory_space<vmem>>, vector<1x8x2xf32>
    tpu.vector_store %arg4[%c0_7, %c0_8, %c0_9], %11 {strides = array<i32>} : memref<1x8x2xf32, #tpu.memory_space<vmem>>, vector<1x8x2xf32>,
    return
  }
  func.func @transform_0(%arg0: i32) -> (i32, i32) {
    %c0_i32 = arith.constant 0 : i32
    %c0_i32_0 = arith.constant 0 : i32
    %c0_i32_1 = arith.constant 0 : i32
    return %c0_i32, %c0_i32_0 : i32, i32
  }
  func.func @transform_1(%arg0: i32) -> (i32, i32) {
    %c0_i32 = arith.constant 0 : i32
    %c0_i32_0 = arith.constant 0 : i32
    return %c0_i32, %arg0 : i32, i32
  }
  func.func @transform_2(%arg0: i32) -> (i32, i32) {
    %c0_i32 = arith.constant 0 : i32
    %c0_i32_0 = arith.constant 0 : i32
    return %c0_i32, %arg0 : i32, i32
  }
  func.func @transform_3(%arg0: i32) -> (i32, i32, i32) {
    %c0_i32 = arith.constant 0 : i32
    %c0_i32_0 = arith.constant 0 : i32
    %c0_i32_1 = arith.constant 0 : i32
    return %arg0, %c0_i32, %c0_i32_0 : i32, i32, i32
  }
}

module attributes {stable_mosaic.version = 11 : i64} {
  func.func @bn_relu_kernel(%arg0: i32, %arg1: memref<8x2xf32, #tpu.memory_space<vmem>>, %arg2: memref<8x512xbf16, #tpu.memory_space<vmem>>, %arg3: memref<8x512xf32, #tpu.memory_space<vmem>>) attributes {dimension_semantics = [#tpu.dimension_semantics<parallel>], iteration_bounds = array<i64: 1>, scalar_prefetch = 0 : i64, scratch_operands = 0 : i64, tpu.core_type = #tpu.core_type<tc>, window_params = [{pipeline_mode = #tpu.pipeline_mode<synchronous>, transform_indices = @transform_0, window_bounds = array<i64: 8, 2>}, {transform_indices = @transform_1, window_bounds = array<i64: 8, 512>}, {transform_indices = @transform_2, window_bounds = array<i64: 8, 512>}]} {
    %c0 = arith.constant 0 : index
    %c0_0 = arith.constant 0 : index
    %0 = vector.load %arg1[%c0, %c0_0] : memref<8x2xf32, #tpu.memory_space<vmem>>, vector<8x1xf32>
    %c0_1 = arith.constant 0 : index
    %c1 = arith.constant 1 : index
    %1 = vector.load %arg1[%c0_1, %c1] : memref<8x2xf32, #tpu.memory_space<vmem>>, vector<8x1xf32>
    %c0_2 = arith.constant 0 : index
    %c0_3 = arith.constant 0 : index
    %2 = vector.load %arg2[%c0_2, %c0_3] : memref<8x512xbf16, #tpu.memory_space<vmem>>, vector<8x512xbf16>
    %3 = arith.extf %2 : vector<8x512xbf16> to vector<8x512xf32>
    %4 = vector.broadcast %0 : vector<8x1xf32> to vector<8x512xf32>
    %5 = arith.mulf %3, %4 : vector<8x512xf32>
    %6 = vector.broadcast %1 : vector<8x1xf32> to vector<8x512xf32>
    %7 = arith.addf %5, %6 : vector<8x512xf32>
    %cst = arith.constant 0.000000e+00 : f32
    %8 = vector.broadcast %cst : f32 to vector<8x512xf32>
    %9 = arith.maximumf %7, %8 : vector<8x512xf32>
    %c0_4 = arith.constant 0 : index
    %c0_5 = arith.constant 0 : index
    %10 = vector.load %arg3[%c0_4, %c0_5] : memref<8x512xf32, #tpu.memory_space<vmem>>, vector<8x512xf32>
    tpu.vector_store %arg3[%c0_4, %c0_5], %9 {strides = array<i32>} : memref<8x512xf32, #tpu.memory_space<vmem>>, vector<8x512xf32>,
    return
  }
  func.func @transform_0(%arg0: i32) -> (i32, i32) {
    %c0_i32 = arith.constant 0 : i32
    %c0_i32_0 = arith.constant 0 : i32
    %c0_i32_1 = arith.constant 0 : i32
    return %c0_i32, %c0_i32_0 : i32, i32
  }
  func.func @transform_1(%arg0: i32) -> (i32, i32) {
    %c0_i32 = arith.constant 0 : i32
    %c0_i32_0 = arith.constant 0 : i32
    return %c0_i32, %arg0 : i32, i32
  }
  func.func @transform_2(%arg0: i32) -> (i32, i32) {
    %c0_i32 = arith.constant 0 : i32
    %c0_i32_0 = arith.constant 0 : i32
    return %c0_i32, %arg0 : i32, i32
  }
}

</mosaic_0001>

<bundles_post_ra>
// kernel: convbr_forward.3
= control target key start
LH: loop header
LB: loop body
LE: loop exit
PB: predicated region body
PF: predicated region fallthrough
CT: control target
= control target key end

     0   :  { %v51_v0 = vmov 0   ;;  %v52_v2 = vmov 1   ;;  %s89_s0 = inlined_call_operand.vmem [shape: f32[8,2], index: 0, kind: input, shape index: {}]   ;;  %s90_s1 = inlined_call_operand.vmem [shape: bf16[8,512], index: 1, kind: input, shape index: {}]   ;;  %s91_s2 = inlined_call_operand.vmem [shape: f32[8,512], index: 2, kind: output, shape index: {}]  }
   0x1   :  { %49 = vset.pattern.permute.xlu0 %v51_v0  ;;  %v11_v1 = vld [vmem:[%s89_s0] sm:$0xff]  ;;  %v13_v5 = vld [vmem:[%s90_s1 + $0x8] sm:$0xff] }
   0x2   :  { %20 = vperm.xlu0 %49, %v11_v1   ;;  %v12_v4 = vld [vmem:[%s90_s1] sm:$0xff]  ;;  %v16_v8 = vunpack.c.l.bf16 %v13_v5  ;;  %v17_v9 = vunpack.c.h.bf16 %v13_v5 }
   0x3   :  { %v14_v6 = vunpack.c.l.bf16 %v12_v4  ;;  %v15_v7 = vunpack.c.h.bf16 %v12_v4 }
   0xa   :  { %50 = vset.pattern.permute.xlu0 %v52_v2 }
   0xb   :  { %28 = vperm.xlu0 %50, %v11_v1  }
  0x74   :  { %v21_v3 = vpop.permute.xlu0 %20 }
  0x75   :  { %v23_v10 = vmul.f32 %v21_v3, %v14_v6  ;;  %v24_v11 = vmul.f32 %v21_v3, %v15_v7  ;;  %v25_v12 = vmul.f32 %v21_v3, %v16_v8  ;;  %v26_v13 = vmul.f32 %v21_v3, %v17_v9 }
  0x7d   :  { %v29_v14 = vpop.permute.xlu0 %28 }
  0x7e   :  { %v31_v15 = vadd.f32 %v29_v14, %v23_v10  ;;  %v32_v16 = vadd.f32 %v29_v14, %v24_v11  ;;  %v33_v17 = vadd.f32 %v29_v14, %v25_v12  ;;  %v34_v18 = vadd.f32 %v29_v14, %v26_v13 }
  0x80   :  { %v35_v19 = vmax.f32 %v31_v15, 0.0  ;;  %v36_v20 = vmax.f32 %v32_v16, 0.0  ;;  %v37_v21 = vmax.f32 %v33_v17, 0.0  ;;  %v38_v22 = vmax.f32 %v34_v18, 0.0 }
  0x82   :  { %39 = vst [vmem:[%s91_s2] sm:$0xff] %v35_v19 }
  0x83   :  { %40 = vst [vmem:[%s91_s2 + $0x8] sm:$0xff] %v36_v20 }
  0x84   :  { %41 = vst [vmem:[%s91_s2 + $0x10] sm:$0xff] %v37_v21 }
  0x85   :  { %42 = vst [vmem:[%s91_s2 + $0x18] sm:$0xff] %v38_v22 }

// kernel: convbr_forward.2
= control target key start
LH: loop header
LB: loop body
LE: loop exit
PB: predicated region body
PF: predicated region fallthrough
CT: control target
= control target key end

     0   :  { %vm79_vm0 = vcmask 1041408   ;;  %vm75_vm1 = vcmask 293888   ;;  %vm162_vm2 = vcmask 7168   ;;  %vm164_vm3 = vcmask 15360   ;;  %s308_s1 = inlined_call_operand.vmem [shape: bf16[36,512], index: 1, kind: input, shape index: {}]   ;;  %s309_s0 = inlined_call_operand.vmem [shape: bf16[8,36], index: 0, kind: input, shape index: {}]   ;;  %s310_s2 = inlined_call_operand.vmem [shape: bf16[8,512], index: 2, kind: output, shape index: {0}]   ;;  %s311_s3 = inlined_call_operand.vmem [shape: f32[1,8,2], index: 3, kind: output, shape index: {1}]  }
   0x1   :  { %v23_v0 = vld [vmem:[%s308_s1 + $0x40] sm:$0x33]  ;;  %v24_v1 = vld [vmem:[%s308_s1 + $0x48] sm:$0x33]  ;;  %v216_v7 = vld [vmem:[%s308_s1 + $0x2c] sm:$0xf0] }
   0x2   :  { %v51_v2 = vunpack.c.l.b16 %v23_v0  ;;  %v52_v3 = vunpack.c.h.b16 %v23_v0  ;;  %v53_v4 = vunpack.c.l.b16 %v24_v1  ;;  %v54_v5 = vunpack.c.h.b16 %v24_v1  ;;  %v192_v6 = vld [vmem:[%s308_s1 + $0x20] sm:$0xf]  ;;  %v214_v12 = vld [vmem:[%s308_s1 + $0x24] sm:$0xf]  ;;  %v194_v13 = vld [vmem:[%s308_s1 + $0x30] sm:$0xf0] }
   0x3   :  { %v200_v14 = vld [vmem:[%s308_s1 + $0x28] sm:$0xf]  ;;  %v217_v15 = vld [vmem:[%s308_s1 + $0x34] sm:$0xf0]  ;;  %v215_v16 = vld [vmem:[%s308_s1 + $0x2c] sm:$0xf]  ;;  %v193_v22 = vor.u32 %v216_v7, %v192_v6  ;;  %v197_v23 = vor.u32 %v214_v12, %v194_v13 }
   0x4   :  { %v63_v8 = vpack.c.b16 %v51_v2, %v51_v2  ;;  %v64_v9 = vpack.c.b16 %v52_v3, %v52_v3  ;;  %v65_v10 = vpack.c.b16 %v53_v4, %v53_v4  ;;  %v66_v11 = vpack.c.b16 %v54_v5, %v54_v5  ;;  %v202_v17 = vld [vmem:[%s308_s1 + $0x38] sm:$0xf0]  ;;  %v176_v24 = vld [vmem:[%s308_s1] sm:$0xf]  ;;  %v212_v25 = vld [vmem:[%s308_s1 + $0xc] sm:$0xf0] }
   0x5   :  { %v201_v26 = vor.u32 %v217_v15, %v200_v14  ;;  %v205_v27 = vor.u32 %v215_v16, %v202_v17  ;;  %v210_v28 = vld [vmem:[%s308_s1 + $0x4] sm:$0xf]  ;;  %v178_v29 = vld [vmem:[%s308_s1 + $0x10] sm:$0xf0]  ;;  %v184_v30 = vld [vmem:[%s308_s1 + $0x8] sm:$0xf]  ;;  %v177_v34 = vor.u32 %v212_v25, %v176_v24 }
   0x6   :  { %v81_v18 = vsel %vm79_vm0, %v63_v8, 0  ;;  %v84_v19 = vsel %vm79_vm0, %v64_v9, 0  ;;  %v87_v20 = vsel %vm79_vm0, %v65_v10, 0  ;;  %v90_v21 = vsel %vm79_vm0, %v66_v11, 0  ;;  %v213_v31 = vld [vmem:[%s308_s1 + $0x14] sm:$0xf0] }
   0x7   :  { %97 = vmatpush.bf16.msra.mxu0 %v81_v18  ;;  %110 = vmatpush.bf16.msra.mxu1 %v84_v19  ;;  %v211_v32 = vld [vmem:[%s308_s1 + $0xc] sm:$0xf]  ;;  %v186_v33 = vld [vmem:[%s308_s1 + $0x18] sm:$0xf0]  ;;  %v181_v35 = vor.u32 %v210_v28, %v178_v29  ;;  %v185_v36 = vor.u32 %v213_v31, %v184_v30  ;;  %v14_v38 = vld [vmem:[%s309_s0] sm:$0xf] }
   0x8   :  { %123 = vmatpush.bf16.msra.mxu2 %v87_v20  ;;  %136 = vmatpush.bf16.msra.mxu3 %v90_v21  ;;  %v189_v37 = vor.u32 %v211_v32, %v186_v33 }
   0xb   :  { %98 = vmatpush.bf16.msra.mxu0 %v193_v22  ;;  %111 = vmatpush.bf16.msra.mxu1 %v197_v23 }
   0xc   :  { %124 = vmatpush.bf16.msra.mxu2 %v201_v26  ;;  %137 = vmatpush.bf16.msra.mxu3 %v205_v27 }
   0xf   :  { %99 = vmatpush.bf16.msra.mxu0 %v177_v34  ;;  %112 = vmatpush.bf16.msra.mxu1 %v181_v35 }
  0x10   :  { %125 = vmatpush.bf16.msra.mxu2 %v185_v36  ;;  %138 = vmatpush.bf16.msra.mxu3 %v189_v37 }
  0x12   :  { %206 = vmatmul.msk.bf16.vlgmr.msra.gmra.mxu0 %vm75_vm1, %v14_v38  ;;  %207 = vmatmul.msk.bf16.vlgmr.msra.gmra.mxu1 %vm75_vm1, %v14_v38 }
  0x13   :  { %208 = vmatmul.msk.bf16.vlgmr.msra.gmra.mxu2 %vm75_vm1, %v14_v38  ;;  %209 = vmatmul.msk.bf16.vlgmr.msra.gmra.mxu3 %vm75_vm1, %v14_v38 }
  0x8f   :  { %v101_v39 = vpop.f32.mrf.mxu0  ;;  %v114_v40 = vpop.f32.mrf.mxu1 }
  0x90   :  { %v144_v41 = vpack.c.bf16 %v114_v40, %v101_v39  ;;  %v148_v42 = vadd.f32 %v114_v40, %v101_v39  ;;  %v153_v43 = vmul.f32 %v101_v39, %v101_v39  ;;  %v154_v44 = vmul.f32 %v114_v40, %v114_v40 }
  0x92   :  { %146 = vst [vmem:[%s310_s2] sm:$0xff] %v144_v41  ;;  %v157_v53 = vadd.f32 %v154_v44, %v153_v43 }
  0x96   :  { %v127_v45 = vpop.f32.mrf.mxu2  ;;  %v140_v46 = vpop.f32.mrf.mxu3 }
  0x97   :  { %v145_v47 = vpack.c.bf16 %v140_v46, %v127_v45  ;;  %v103_v48 = vpop.f32.mrf.mxu0  ;;  %v116_v49 = vpop.f32.mrf.mxu1  ;;  %v149_v50 = vadd.f32 %v148_v42, %v127_v45  ;;  %v155_v51 = vmul.f32 %v127_v45, %v127_v45  ;;  %v156_v54 = vmul.f32 %v140_v46, %v140_v46 }
  0x99   :  { %147 = vst [vmem:[%s310_s2 + $0x8] sm:$0xff] %v145_v47  ;;  %v150_v52 = vadd.f32 %v149_v50, %v140_v46  ;;  %v158_v55 = vadd.f32 %v157_v53, %v155_v51 }
  0x9b   :  { %151 = vadd.xlane.f32.xlu0 %v150_v52  ;;  %v159_v58 = vadd.f32 %v158_v55, %v156_v54 }
  0x9e   :  { %v129_v56 = vpop.f32.mrf.mxu2  ;;  %v142_v57 = vpop.f32.mrf.mxu3 }
  0xa3   :  { %160 = vadd.xlane.f32.xlu0 %v159_v58 }
 0x10e   :  { %v152_v59 = vpop.xlane.xlu0 %151 }
 0x116   :  { %v161_v60 = vpop.xlane.xlu0 %160 }
 0x117   :  { %v163_v61 = vsel %vm162_vm2, %v152_v59, %v161_v60 }
 0x118   :  { %165 = vst.msk [vmem:[%s311_s3] sm:$0xff] %vm164_vm3, %v163_v61 }

</bundles_post_ra>
